<compile_context>
chip_gen: v5e
topology: v5e:2x2
jax: 0.10.0
libtpu: 0.0.40
codegen_flags: <defaults>
</compile_context>

<pallas_src>
import functools
import math

import jax
import jax.numpy as jnp
from jax.experimental import pallas as pl
from jax.experimental.pallas import tpu as pltpu


def _mha_kernel(q_ref, k_ref, v_ref, mask_ref,
                wq_ref, wk_ref, wv_ref, wfc_ref,
                gamma_ref, beta_ref,
                out_ref,
                kc_ref, vc_ref, pv_ref,
                *, n_heads, d_k, eps, mxu_dtype, mask_per_head, approx_recip):
    """One (batch, q-tile) grid step: full multi-head attention + residual + LayerNorm."""
    qt = pl.program_id(1)
    cast = (lambda x: x.astype(mxu_dtype)) if mxu_dtype is not None else (lambda x: x)

    # ---- K/V projections depend only on the batch element: compute once at the first
    # q-tile and cache in VMEM scratch; reused for qt > 0 (grid's qt axis is "arbitrary",
    # so within each batch element qt==0 runs first on the owning core).
    @pl.when(qt == 0)
    def _():
        kc_ref[...] = jnp.dot(cast(k_ref[0]), wk_ref[...],
                              preferred_element_type=jnp.float32).astype(kc_ref.dtype)
        vc_ref[...] = jnp.dot(cast(v_ref[0]), wv_ref[...],
                              preferred_element_type=jnp.float32).astype(vc_ref.dtype)

    # ---- Q projection for this tile (1/sqrt(d_k) already folded into Wq by the wrapper).
    # Inputs go to the MXU in native (or bf16) dtype; accumulation stays fp32.
    q_proj = jnp.dot(cast(q_ref[0]), wq_ref[...],
                     preferred_element_type=jnp.float32)                     # (tq, D)

    # ---- per-head attention (static unrolled loop; all tensors stay 2-D).
    # Each head's pv lands in its column slice of the (tq, D) scratch, which is then
    # consumed by a single MXU-shaped Wfc matmul in the epilogue.
    for h in range(n_heads):
        sl = slice(h * d_k, (h + 1) * d_k)
        Qh = q_proj[:, sl]                                                   # (tq, dk) f32
        Kh = kc_ref[:, sl]                                                   # (Lk, dk)
        Vh = vc_ref[:, sl]                                                   # (Lk, dk)
        # scores = Qh @ Kh^T without an explicit XLU transpose: contract last dims.
        s = jax.lax.dot_general(cast(Qh), Kh, (((1,), (1,)), ((), ())),
                                preferred_element_type=jnp.float32)          # (tq, Lk)
        s = s + mask_ref[0, h if mask_per_head else 0].astype(jnp.float32)
        # numerically stable softmax over keys (matches torch.softmax); the reciprocal
        # goes to the otherwise-idle EUP slot when approx_recip=True.
        m = jnp.max(s, axis=-1, keepdims=True)
        e = jnp.exp(s - m)
        p = e * pl.reciprocal(jnp.sum(e, axis=-1, keepdims=True), approx=approx_recip)
        pv_ref[:, sl] = jnp.dot(cast(p), Vh, preferred_element_type=jnp.float32)

    # ---- single full-width output projection + residual + LayerNorm(eps) epilogue.
    x = jnp.dot(cast(pv_ref[...]), wfc_ref[...],
                preferred_element_type=jnp.float32)                          # (tq, Dm)
    y = q_ref[0].astype(jnp.float32) + x                                     # residual
    mu = jnp.mean(y, axis=-1, keepdims=True)
    var = jnp.mean((y - mu) * (y - mu), axis=-1, keepdims=True)              # biased var
    y = (y - mu) * jax.lax.rsqrt(var + jnp.float32(eps))
    out_ref[0] = (y * gamma_ref[...].astype(jnp.float32)
                  + beta_ref[...].astype(jnp.float32)).astype(out_ref.dtype)


def _default_vmem_limit_bytes():
    """~3/4 of physical VMEM (capped at 100 MiB) so v5e/v6e get real headroom and v7x
    (64 MiB physical) still fits."""
    try:
        cap = int(pltpu.get_tpu_info().vmem_capacity_bytes)
    except Exception:
        cap = 128 * 1024 * 1024
    return min((cap * 3) // 4, 100 * 1024 * 1024)


def multi_headed_attention(query, key, value, mask,
                           w_Q, w_K, w_V, w_fc, gamma, beta,
                           *, n_heads, eps=1e-6, mxu_dtype=None,
                           approx_recip=True, max_tq=256, vmem_limit_bytes=None):
    """query/key/value: (B, L, d_model); mask: additive, broadcastable shape
    (B or 1, n_heads or 1, Lq or 1, Lk).  w_*: PyTorch Linear weights (out, in).
    Set mxu_dtype=jnp.bfloat16 to run the matmuls with bf16 operands (fp32 accumulation) —
    recommended on v5e/v6e/v7x whenever the kernel is MXU-bound."""
    B, Lq, Dm = query.shape
    Lk = key.shape[1]
    Lv = value.shape[1]
    assert Lk == Lv, "attention requires len_k == len_v"
    D = w_Q.shape[0]
    assert D == Dm and D % n_heads == 0
    H = n_heads
    dk = D // H

    # q-tile: largest of (max_tq, 128) that divides Lq, else the whole sequence.
    tq = Lq
    for t in (max_tq, 128):
        if t <= Lq and Lq % t == 0:
            tq = t
            break
    # TODO(synk): padded/edge-tile path for large Lq not divisible by 128.
    n_qt = Lq // tq

    # ---- wrapper-side glue (pure layout work; no extra in-kernel compute) ----
    inv_temp = 1.0 / math.sqrt(float(dk))
    wq2 = w_Q.T * inv_temp            # (Dm, D); 1/sqrt(d_k) folded into Wq
    wk2 = w_K.T                       # (Dm, D)
    wv2 = w_V.T                       # (Dm, D)
    wfc2 = w_fc.T                     # (D, Dm)
    if mxu_dtype is not None:
        wq2, wk2, wv2, wfc2 = (w.astype(mxu_dtype) for w in (wq2, wk2, wv2, wfc2))
    gamma2 = gamma.reshape(1, Dm)
    beta2 = beta.reshape(1, Dm)
    cache_dtype = mxu_dtype if mxu_dtype is not None else jnp.float32

    Bm, Hm, Lqm, Lkm = mask.shape
    assert Bm in (1, B) and Hm in (1, H) and Lqm in (1, Lq) and Lkm == Lk, \
        "mask must be additively broadcastable to (B, n_heads, Lq, Lk)"
    mq_full = (Lqm == Lq)
    mask_block = (1, Hm, tq if mq_full else 1, Lk)

    def mask_map(b, qt):
        return (b if Bm == B else 0, 0, qt if mq_full else 0, 0)

    if vmem_limit_bytes is None:
        vmem_limit_bytes = _default_vmem_limit_bytes()

    # Advisory cost estimate so XLA schedules neighbors around the custom call.
    itemsize = query.dtype.itemsize
    proj_flops = 2 * B * Dm * D * (Lq + Lk + Lv) + 2 * B * Lq * D * Dm
    attn_flops = 4 * B * H * Lq * Lk * dk
    flops = int(proj_flops + attn_flops)
    transcendentals = int(B * H * Lq * Lk + B * H * Lq + B * Lq)
    bytes_accessed = int(sum(a.size * a.dtype.itemsize for a in
                             (query, key, value, mask, wq2, wk2, wv2, wfc2,
                              gamma2, beta2)) + B * Lq * Dm * itemsize)

    kernel = functools.partial(_mha_kernel, n_heads=H, d_k=dk, eps=eps,
                               mxu_dtype=mxu_dtype, mask_per_head=(Hm == H),
                               approx_recip=approx_recip)

    return pl.pallas_call(
        kernel,
        out_shape=jax.ShapeDtypeStruct((B, Lq, Dm), query.dtype),
        grid_spec=pltpu.PrefetchScalarGridSpec(
            num_scalar_prefetch=0,
            grid=(B, n_qt),
            in_specs=[
                pl.BlockSpec((1, tq, Dm), lambda b, qt: (b, qt, 0)),   # query tile
                pl.BlockSpec((1, Lk, Dm), lambda b, qt: (b, 0, 0)),    # key   (per-b DMA)
                pl.BlockSpec((1, Lv, Dm), lambda b, qt: (b, 0, 0)),    # value (per-b DMA)
                pl.BlockSpec(mask_block, mask_map),                    # mask slice
                pl.BlockSpec((Dm, D), lambda b, qt: (0, 0)),           # Wq (VMEM-resident)
                pl.BlockSpec((Dm, D), lambda b, qt: (0, 0)),           # Wk (VMEM-resident)
                pl.BlockSpec((Dm, D), lambda b, qt: (0, 0)),           # Wv (VMEM-resident)
                pl.BlockSpec((D, Dm), lambda b, qt: (0, 0)),           # Wfc (VMEM-resident)
                pl.BlockSpec((1, Dm), lambda b, qt: (0, 0)),           # LN gamma
                pl.BlockSpec((1, Dm), lambda b, qt: (0, 0)),           # LN beta
            ],
            out_specs=pl.BlockSpec((1, tq, Dm), lambda b, qt: (b, qt, 0)),
            scratch_shapes=[
                pltpu.VMEM((Lk, D), cache_dtype),    # projected K cache (per batch elem)
                pltpu.VMEM((Lv, D), cache_dtype),    # projected V cache (per batch elem)
                pltpu.VMEM((tq, D), jnp.float32),    # per-head pv slab -> one Wfc matmul
            ],
        ),
        # qt is "arbitrary" (K/V cache must be filled at qt==0 before qt>0 on the same
        # core); B stays "parallel" for megacore sharding (keep B >= 2 on v7x).
        compiler_params=pltpu.CompilerParams(
            dimension_semantics=("parallel", "arbitrary"),
            vmem_limit_bytes=int(vmem_limit_bytes)),
        cost_estimate=pl.CostEstimate(flops=flops,
                                      transcendentals=transcendentals,
                                      bytes_accessed=bytes_accessed),
    )(query, key, value, mask, wq2, wk2, wv2, wfc2, gamma2, beta2)


def _reference(query, key, value, mask, w_Q, w_K, w_V, w_fc, gamma, beta, *, n_heads):
    """Pure-JAX reference mirroring the PyTorch forward (dropout=0)."""
    B, Lq, D = query.shape
    Lk = key.shape[1]
    dk = D // n_heads
    q = (query @ w_Q.T).reshape(B, Lq, n_heads, dk).transpose(0, 2, 1, 3)
    k = (key @ w_K.T).reshape(B, Lk, n_heads, dk).transpose(0, 2, 1, 3)
    v = (value @ w_V.T).reshape(B, Lk, n_heads, dk).transpose(0, 2, 1, 3)
    attn = jnp.einsum("bhqd,bhkd->bhqk", q, k) / (dk ** 0.5)
    attn = attn + mask
    p = jax.nn.softmax(attn, axis=-1)
    x = jnp.einsum("bhqk,bhkd->bhqd", p, v)
    x = x.transpose(0, 2, 1, 3).reshape(B, Lq, D)
    x = x @ w_fc.T
    y = query + x
    mu = jnp.mean(y, axis=-1, keepdims=True)
    var = jnp.mean((y - mu) ** 2, axis=-1, keepdims=True)
    return (y - mu) / jnp.sqrt(var + 1e-6) * gamma + beta


def _causal_mask(L):
    causal = jnp.tril(jnp.ones((L, L), dtype=jnp.float32))
    return jnp.where(causal > 0, 0.0, -1e9).astype(jnp.float32)[None, None, :, :]


if __name__ == "__main__":
    # ---------------- small shapes: batch=2, seq=8, d_model=32, n_heads=4 ----------------
    B, L, D, H = 2, 8, 32, 4

    key0 = jax.random.PRNGKey(0)
    ks = jax.random.split(key0, 8)

    query = jax.random.normal(ks[0], (B, L, D), dtype=jnp.float32)
    key_in = jax.random.normal(ks[1], (B, L, D), dtype=jnp.float32)
    value = jax.random.normal(ks[2], (B, L, D), dtype=jnp.float32)
    mask = _causal_mask(L)                       # broadcastable (1, 1, L, L) additive mask

    scale = 1.0 / (D ** 0.5)                     # PyTorch Linear weight shape: (out, in)
    w_Q = jax.random.uniform(ks[3], (D, D), jnp.float32, -scale, scale)
    w_K = jax.random.uniform(ks[4], (D, D), jnp.float32, -scale, scale)
    w_V = jax.random.uniform(ks[5], (D, D), jnp.float32, -scale, scale)
    w_fc = jax.random.uniform(ks[6], (D, D), jnp.float32, -scale, scale)
    gamma = jnp.ones((D,), jnp.float32)          # nn.LayerNorm default weight
    beta = jnp.zeros((D,), jnp.float32)          # nn.LayerNorm default bias

    ref = _reference(query, key_in, value, mask, w_Q, w_K, w_V, w_fc, gamma, beta,
                     n_heads=H)

    # Exact path (fp32 MXU operands, exact softmax reciprocal): tight tolerance.
    out = multi_headed_attention(query, key_in, value, mask,
                                 w_Q, w_K, w_V, w_fc, gamma, beta,
                                 n_heads=H, mxu_dtype=None, approx_recip=False)
    out = jax.block_until_ready(out)
    assert out.shape == (B, L, D)
    assert jnp.allclose(out, ref, atol=1e-4, rtol=1e-4), (
        f"exact path max abs err {jnp.max(jnp.abs(out - ref))}")

    # Perf path (bf16 MXU operands + EUP approximate reciprocal): loose tolerance.
    out_fast = multi_headed_attention(query, key_in, value, mask,
                                      w_Q, w_K, w_V, w_fc, gamma, beta,
                                      n_heads=H, mxu_dtype=jnp.bfloat16,
                                      approx_recip=True)
    out_fast = jax.block_until_ready(out_fast)
    assert jnp.allclose(out_fast, ref, atol=5e-2, rtol=5e-2), (
        f"bf16/approx path max abs err {jnp.max(jnp.abs(out_fast - ref))}")

    # --------- medium run to exercise q-tiling + the cross-tile K/V projection cache -----
    L2 = 256
    ks2 = jax.random.split(jax.random.PRNGKey(1), 3)
    query2 = jax.random.normal(ks2[0], (B, L2, D), dtype=jnp.float32)
    key2 = jax.random.normal(ks2[1], (B, L2, D), dtype=jnp.float32)
    value2 = jax.random.normal(ks2[2], (B, L2, D), dtype=jnp.float32)
    mask2 = _causal_mask(L2)

    ref2 = _reference(query2, key2, value2, mask2, w_Q, w_K, w_V, w_fc, gamma, beta,
                      n_heads=H)
    out2 = multi_headed_attention(query2, key2, value2, mask2,
                                  w_Q, w_K, w_V, w_fc, gamma, beta,
                                  n_heads=H, mxu_dtype=None, approx_recip=False,
                                  max_tq=128)          # -> tq=128, n_qt=2 (cache reused)
    out2 = jax.block_until_ready(out2)
    assert out2.shape == (B, L2, D)
    assert jnp.allclose(out2, ref2, atol=1e-4, rtol=1e-4), (
        f"tiled path max abs err {jnp.max(jnp.abs(out2 - ref2))}")

    print("KERNEL_OK")
</pallas_src>

<mosaic_0001>
module attributes {stable_mosaic.version = 11 : i64} {
  func.func @_mha_kernel(%arg0: i32, %arg1: i32, %arg2: memref<1x8x32xf32, #tpu.memory_space<vmem>>, %arg3: memref<1x8x32xf32, #tpu.memory_space<vmem>>, %arg4: memref<1x8x32xf32, #tpu.memory_space<vmem>>, %arg5: memref<1x1x8x8xf32, #tpu.memory_space<vmem>>, %arg6: memref<32x32xf32, #tpu.memory_space<vmem>>, %arg7: memref<32x32xf32, #tpu.memory_space<vmem>>, %arg8: memref<32x32xf32, #tpu.memory_space<vmem>>, %arg9: memref<32x32xf32, #tpu.memory_space<vmem>>, %arg10: memref<1x32xf32, #tpu.memory_space<vmem>>, %arg11: memref<1x32xf32, #tpu.memory_space<vmem>>, %arg12: memref<1x8x32xf32, #tpu.memory_space<vmem>>, %arg13: memref<8x32xf32, #tpu.memory_space<vmem>>, %arg14: memref<8x32xf32, #tpu.memory_space<vmem>>, %arg15: memref<8x32xf32, #tpu.memory_space<vmem>>) attributes {dimension_semantics = [#tpu.dimension_semantics<parallel>, #tpu.dimension_semantics<arbitrary>], iteration_bounds = array<i64: 2, 1>, scalar_prefetch = 0 : i64, scratch_operands = 3 : i64, tpu.core_type = #tpu.core_type<tc>, window_params = [{transform_indices = @transform_0, window_bounds = array<i64: 1, 8, 32>}, {transform_indices = @transform_1, window_bounds = array<i64: 1, 8, 32>}, {transform_indices = @transform_2, window_bounds = array<i64: 1, 8, 32>}, {transform_indices = @transform_3, window_bounds = array<i64: 1, 1, 8, 8>}, {pipeline_mode = #tpu.pipeline_mode<synchronous>, transform_indices = @transform_4, window_bounds = array<i64: 32, 32>}, {pipeline_mode = #tpu.pipeline_mode<synchronous>, transform_indices = @transform_5, window_bounds = array<i64: 32, 32>}, {pipeline_mode = #tpu.pipeline_mode<synchronous>, transform_indices = @transform_6, window_bounds = array<i64: 32, 32>}, {pipeline_mode = #tpu.pipeline_mode<synchronous>, transform_indices = @transform_7, window_bounds = array<i64: 32, 32>}, {pipeline_mode = #tpu.pipeline_mode<synchronous>, transform_indices = @transform_8, window_bounds = array<i64: 1, 32>}, {pipeline_mode = #tpu.pipeline_mode<synchronous>, transform_indices = @transform_9, window_bounds = array<i64: 1, 32>}, {transform_indices = @transform_10, window_bounds = array<i64: 1, 8, 32>}]} {
    %c0_i32 = arith.constant 0 : i32
    %0 = arith.cmpi eq, %arg1, %c0_i32 : i32
    %1 = arith.extui %0 : i1 to i32
    %c0_i32_0 = arith.constant 0 : i32
    %2 = arith.cmpi ne, %1, %c0_i32_0 : i32
    scf.if %2 {
      %c0_78 = arith.constant 0 : index
      %c0_79 = arith.constant 0 : index
      %c0_80 = arith.constant 0 : index
      %118 = vector.load %arg3[%c0_78, %c0_79, %c0_80] : memref<1x8x32xf32, #tpu.memory_space<vmem>>, vector<1x8x32xf32>
      %119 = vector.shape_cast %118 : vector<1x8x32xf32> to vector<8x32xf32>
      %c0_81 = arith.constant 0 : index
      %c0_82 = arith.constant 0 : index
      %120 = vector.load %arg7[%c0_81, %c0_82] : memref<32x32xf32, #tpu.memory_space<vmem>>, vector<32x32xf32>
      %cst_83 = arith.constant dense<0.000000e+00> : vector<8x32xf32>
      %121 = tpu.matmul %119, %120, %cst_83 {dimension_numbers = #tpu.dot_dimension_numbers<[1], [0], [0], [1], [0, 0, 1, 1], [], []>} : vector<8x32xf32>, vector<32x32xf32>, vector<8x32xf32> -> vector<8x32xf32>
      %c0_84 = arith.constant 0 : index
      %c0_85 = arith.constant 0 : index
      %122 = vector.load %arg13[%c0_84, %c0_85] : memref<8x32xf32, #tpu.memory_space<vmem>>, vector<8x32xf32>
      tpu.vector_store %arg13[%c0_84, %c0_85], %121 {strides = array<i32>} : memref<8x32xf32, #tpu.memory_space<vmem>>, vector<8x32xf32>,
      %c0_86 = arith.constant 0 : index
      %c0_87 = arith.constant 0 : index
      %c0_88 = arith.constant 0 : index
      %123 = vector.load %arg4[%c0_86, %c0_87, %c0_88] : memref<1x8x32xf32, #tpu.memory_space<vmem>>, vector<1x8x32xf32>
      %124 = vector.shape_cast %123 : vector<1x8x32xf32> to vector<8x32xf32>
      %c0_89 = arith.constant 0 : index
      %c0_90 = arith.constant 0 : index
      %125 = vector.load %arg8[%c0_89, %c0_90] : memref<32x32xf32, #tpu.memory_space<vmem>>, vector<32x32xf32>
      %cst_91 = arith.constant dense<0.000000e+00> : vector<8x32xf32>
      %126 = tpu.matmul %124, %125, %cst_91 {dimension_numbers = #tpu.dot_dimension_numbers<[1], [0], [0], [1], [0, 0, 1, 1], [], []>} : vector<8x32xf32>, vector<32x32xf32>, vector<8x32xf32> -> vector<8x32xf32>
      %c0_92 = arith.constant 0 : index
      %c0_93 = arith.constant 0 : index
      %127 = vector.load %arg14[%c0_92, %c0_93] : memref<8x32xf32, #tpu.memory_space<vmem>>, vector<8x32xf32>
      tpu.vector_store %arg14[%c0_92, %c0_93], %126 {strides = array<i32>} : memref<8x32xf32, #tpu.memory_space<vmem>>, vector<8x32xf32>,
    } else {
    }
    %c0 = arith.constant 0 : index
    %c0_1 = arith.constant 0 : index
    %c0_2 = arith.constant 0 : index
    %3 = vector.load %arg2[%c0, %c0_1, %c0_2] : memref<1x8x32xf32, #tpu.memory_space<vmem>>, vector<1x8x32xf32>
    %4 = vector.shape_cast %3 : vector<1x8x32xf32> to vector<8x32xf32>
    %c0_3 = arith.constant 0 : index
    %c0_4 = arith.constant 0 : index
    %5 = vector.load %arg6[%c0_3, %c0_4] : memref<32x32xf32, #tpu.memory_space<vmem>>, vector<32x32xf32>
    %cst = arith.constant dense<0.000000e+00> : vector<8x32xf32>
    %6 = tpu.matmul %4, %5, %cst {dimension_numbers = #tpu.dot_dimension_numbers<[1], [0], [0], [1], [0, 0, 1, 1], [], []>} : vector<8x32xf32>, vector<32x32xf32>, vector<8x32xf32> -> vector<8x32xf32>
    %7 = vector.extract_strided_slice %6 {offsets = [0, 0], sizes = [8, 8], strides = [1, 1]} : vector<8x32xf32> to vector<8x8xf32>
    %c0_5 = arith.constant 0 : index
    %c0_6 = arith.constant 0 : index
    %8 = vector.load %arg13[%c0_5, %c0_6] : memref<8x32xf32, #tpu.memory_space<vmem>>, vector<8x8xf32>
    %c0_7 = arith.constant 0 : index
    %c0_8 = arith.constant 0 : index
    %9 = vector.load %arg14[%c0_7, %c0_8] : memref<8x32xf32, #tpu.memory_space<vmem>>, vector<8x8xf32>
    %cst_9 = arith.constant dense<0.000000e+00> : vector<8x8xf32>
    %10 = tpu.matmul %7, %8, %cst_9 {dimension_numbers = #tpu.dot_dimension_numbers<[1], [1], [0], [0], [0, 0, 1, 0], [], []>} : vector<8x8xf32>, vector<8x8xf32>, vector<8x8xf32> -> vector<8x8xf32>
    %c0_10 = arith.constant 0 : index
    %c0_11 = arith.constant 0 : index
    %c0_12 = arith.constant 0 : index
    %c0_13 = arith.constant 0 : index
    %11 = vector.load %arg5[%c0_10, %c0_11, %c0_12, %c0_13] : memref<1x1x8x8xf32, #tpu.memory_space<vmem>>, vector<1x1x8x8xf32>
    %12 = vector.shape_cast %11 : vector<1x1x8x8xf32> to vector<8x8xf32>
    %13 = arith.addf %10, %12 : vector<8x8xf32>
    %cst_14 = arith.constant dense<0xFF800000> : vector<8xf32>
    %14 = vector.multi_reduction <maximumf>, %13, %cst_14 [1] : vector<8x8xf32> to vector<8xf32>
    %15 = vector.shape_cast %14 : vector<8xf32> to vector<8x1xf32>
    %16 = vector.broadcast %15 : vector<8x1xf32> to vector<8x8xf32>
    %17 = arith.subf %13, %16 : vector<8x8xf32>
    %18 = math.exp %17 : vector<8x8xf32>
    %cst_15 = arith.constant dense<0.000000e+00> : vector<8xf32>
    %19 = vector.multi_reduction <add>, %18, %cst_15 [1] : vector<8x8xf32> to vector<8xf32>
    %20 = vector.shape_cast %19 : vector<8xf32> to vector<8x1xf32>
    %21 = tpu.reciprocal %20 : vector<8x1xf32> -> vector<8x1xf32>
    %22 = vector.broadcast %21 : vector<8x1xf32> to vector<8x8xf32>
    %23 = arith.mulf %18, %22 : vector<8x8xf32>
    %cst_16 = arith.constant dense<0.000000e+00> : vector<8x8xf32>
    %24 = tpu.matmul %23, %9, %cst_16 {dimension_numbers = #tpu.dot_dimension_numbers<[1], [0], [0], [1], [0, 0, 1, 1], [], []>} : vector<8x8xf32>, vector<8x8xf32>, vector<8x8xf32> -> vector<8x8xf32>
    %c0_17 = arith.constant 0 : index
    %c0_18 = arith.constant 0 : index
    %25 = vector.load %arg15[%c0_17, %c0_18] : memref<8x32xf32, #tpu.memory_space<vmem>>, vector<8x8xf32>
    tpu.vector_store %arg15[%c0_17, %c0_18], %24 {strides = array<i32>} : memref<8x32xf32, #tpu.memory_space<vmem>>, vector<8x8xf32>,
    %26 = vector.extract_strided_slice %6 {offsets = [0, 8], sizes = [8, 8], strides = [1, 1]} : vector<8x32xf32> to vector<8x8xf32>
    %c0_19 = arith.constant 0 : index
    %c8 = arith.constant 8 : index
    %27 = vector.load %arg13[%c0_19, %c8] : memref<8x32xf32, #tpu.memory_space<vmem>>, vector<8x8xf32>
    %c0_20 = arith.constant 0 : index
    %c8_21 = arith.constant 8 : index
    %28 = vector.load %arg14[%c0_20, %c8_21] : memref<8x32xf32, #tpu.memory_space<vmem>>, vector<8x8xf32>
    %cst_22 = arith.constant dense<0.000000e+00> : vector<8x8xf32>
    %29 = tpu.matmul %26, %27, %cst_22 {dimension_numbers = #tpu.dot_dimension_numbers<[1], [1], [0], [0], [0, 0, 1, 0], [], []>} : vector<8x8xf32>, vector<8x8xf32>, vector<8x8xf32> -> vector<8x8xf32>
    %c0_23 = arith.constant 0 : index
    %c0_24 = arith.constant 0 : index
    %c0_25 = arith.constant 0 : index
    %c0_26 = arith.constant 0 : index
    %30 = vector.load %arg5[%c0_23, %c0_24, %c0_25, %c0_26] : memref<1x1x8x8xf32, #tpu.memory_space<vmem>>, vector<1x1x8x8xf32>
    %31 = vector.shape_cast %30 : vector<1x1x8x8xf32> to vector<8x8xf32>
    %32 = arith.addf %29, %31 : vector<8x8xf32>
    %cst_27 = arith.constant dense<0xFF800000> : vector<8xf32>
    %33 = vector.multi_reduction <maximumf>, %32, %cst_27 [1] : vector<8x8xf32> to vector<8xf32>
    %34 = vector.shape_cast %33 : vector<8xf32> to vector<8x1xf32>
    %35 = vector.broadcast %34 : vector<8x1xf32> to vector<8x8xf32>
    %36 = arith.subf %32, %35 : vector<8x8xf32>
    %37 = math.exp %36 : vector<8x8xf32>
    %cst_28 = arith.constant dense<0.000000e+00> : vector<8xf32>
    %38 = vector.multi_reduction <add>, %37, %cst_28 [1] : vector<8x8xf32> to vector<8xf32>
    %39 = vector.shape_cast %38 : vector<8xf32> to vector<8x1xf32>
    %40 = tpu.reciprocal %39 : vector<8x1xf32> -> vector<8x1xf32>
    %41 = vector.broadcast %40 : vector<8x1xf32> to vector<8x8xf32>
    %42 = arith.mulf %37, %41 : vector<8x8xf32>
    %cst_29 = arith.constant dense<0.000000e+00> : vector<8x8xf32>
    %43 = tpu.matmul %42, %28, %cst_29 {dimension_numbers = #tpu.dot_dimension_numbers<[1], [0], [0], [1], [0, 0, 1, 1], [], []>} : vector<8x8xf32>, vector<8x8xf32>, vector<8x8xf32> -> vector<8x8xf32>
    %c0_30 = arith.constant 0 : index
    %c8_31 = arith.constant 8 : index
    %44 = vector.load %arg15[%c0_30, %c8_31] : memref<8x32xf32, #tpu.memory_space<vmem>>, vector<8x8xf32>
    tpu.vector_store %arg15[%c0_30, %c8_31], %43 {strides = array<i32>} : memref<8x32xf32, #tpu.memory_space<vmem>>, vector<8x8xf32>,
    %45 = vector.extract_strided_slice %6 {offsets = [0, 16], sizes = [8, 8], strides = [1, 1]} : vector<8x32xf32> to vector<8x8xf32>
    %c0_32 = arith.constant 0 : index
    %c16 = arith.constant 16 : index
    %46 = vector.load %arg13[%c0_32, %c16] : memref<8x32xf32, #tpu.memory_space<vmem>>, vector<8x8xf32>
    %c0_33 = arith.constant 0 : index
    %c16_34 = arith.constant 16 : index
    %47 = vector.load %arg14[%c0_33, %c16_34] : memref<8x32xf32, #tpu.memory_space<vmem>>, vector<8x8xf32>
    %cst_35 = arith.constant dense<0.000000e+00> : vector<8x8xf32>
    %48 = tpu.matmul %45, %46, %cst_35 {dimension_numbers = #tpu.dot_dimension_numbers<[1], [1], [0], [0], [0, 0, 1, 0], [], []>} : vector<8x8xf32>, vector<8x8xf32>, vector<8x8xf32> -> vector<8x8xf32>
    %c0_36 = arith.constant 0 : index
    %c0_37 = arith.constant 0 : index
    %c0_38 = arith.constant 0 : index
    %c0_39 = arith.constant 0 : index
    %49 = vector.load %arg5[%c0_36, %c0_37, %c0_38, %c0_39] : memref<1x1x8x8xf32, #tpu.memory_space<vmem>>, vector<1x1x8x8xf32>
    %50 = vector.shape_cast %49 : vector<1x1x8x8xf32> to vector<8x8xf32>
    %51 = arith.addf %48, %50 : vector<8x8xf32>
    %cst_40 = arith.constant dense<0xFF800000> : vector<8xf32>
    %52 = vector.multi_reduction <maximumf>, %51, %cst_40 [1] : vector<8x8xf32> to vector<8xf32>
    %53 = vector.shape_cast %52 : vector<8xf32> to vector<8x1xf32>
    %54 = vector.broadcast %53 : vector<8x1xf32> to vector<8x8xf32>
    %55 = arith.subf %51, %54 : vector<8x8xf32>
    %56 = math.exp %55 : vector<8x8xf32>
    %cst_41 = arith.constant dense<0.000000e+00> : vector<8xf32>
    %57 = vector.multi_reduction <add>, %56, %cst_41 [1] : vector<8x8xf32> to vector<8xf32>
    %58 = vector.shape_cast %57 : vector<8xf32> to vector<8x1xf32>
    %59 = tpu.reciprocal %58 : vector<8x1xf32> -> vector<8x1xf32>
    %60 = vector.broadcast %59 : vector<8x1xf32> to vector<8x8xf32>
    %61 = arith.mulf %56, %60 : vector<8x8xf32>
    %cst_42 = arith.constant dense<0.000000e+00> : vector<8x8xf32>
    %62 = tpu.matmul %61, %47, %cst_42 {dimension_numbers = #tpu.dot_dimension_numbers<[1], [0], [0], [1], [0, 0, 1, 1], [], []>} : vector<8x8xf32>, vector<8x8xf32>, vector<8x8xf32> -> vector<8x8xf32>
    %c0_43 = arith.constant 0 : index
    %c16_44 = arith.constant 16 : index
    %63 = vector.load %arg15[%c0_43, %c16_44] : memref<8x32xf32, #tpu.memory_space<vmem>>, vector<8x8xf32>
    tpu.vector_store %arg15[%c0_43, %c16_44], %62 {strides = array<i32>} : memref<8x32xf32, #tpu.memory_space<vmem>>, vector<8x8xf32>,
    %64 = vector.extract_strided_slice %6 {offsets = [0, 24], sizes = [8, 8], strides = [1, 1]} : vector<8x32xf32> to vector<8x8xf32>
    %c0_45 = arith.constant 0 : index
    %c24 = arith.constant 24 : index
    %65 = vector.load %arg13[%c0_45, %c24] : memref<8x32xf32, #tpu.memory_space<vmem>>, vector<8x8xf32>
    %c0_46 = arith.constant 0 : index
    %c24_47 = arith.constant 24 : index
    %66 = vector.load %arg14[%c0_46, %c24_47] : memref<8x32xf32, #tpu.memory_space<vmem>>, vector<8x8xf32>
    %cst_48 = arith.constant dense<0.000000e+00> : vector<8x8xf32>
    %67 = tpu.matmul %64, %65, %cst_48 {dimension_numbers = #tpu.dot_dimension_numbers<[1], [1], [0], [0], [0, 0, 1, 0], [], []>} : vector<8x8xf32>, vector<8x8xf32>, vector<8x8xf32> -> vector<8x8xf32>
    %c0_49 = arith.constant 0 : index
    %c0_50 = arith.constant 0 : index
    %c0_51 = arith.constant 0 : index
    %c0_52 = arith.constant 0 : index
    %68 = vector.load %arg5[%c0_49, %c0_50, %c0_51, %c0_52] : memref<1x1x8x8xf32, #tpu.memory_space<vmem>>, vector<1x1x8x8xf32>
    %69 = vector.shape_cast %68 : vector<1x1x8x8xf32> to vector<8x8xf32>
    %70 = arith.addf %67, %69 : vector<8x8xf32>
    %cst_53 = arith.constant dense<0xFF800000> : vector<8xf32>
    %71 = vector.multi_reduction <maximumf>, %70, %cst_53 [1] : vector<8x8xf32> to vector<8xf32>
    %72 = vector.shape_cast %71 : vector<8xf32> to vector<8x1xf32>
    %73 = vector.broadcast %72 : vector<8x1xf32> to vector<8x8xf32>
    %74 = arith.subf %70, %73 : vector<8x8xf32>
    %75 = math.exp %74 : vector<8x8xf32>
    %cst_54 = arith.constant dense<0.000000e+00> : vector<8xf32>
    %76 = vector.multi_reduction <add>, %75, %cst_54 [1] : vector<8x8xf32> to vector<8xf32>
    %77 = vector.shape_cast %76 : vector<8xf32> to vector<8x1xf32>
    %78 = tpu.reciprocal %77 : vector<8x1xf32> -> vector<8x1xf32>
    %79 = vector.broadcast %78 : vector<8x1xf32> to vector<8x8xf32>
    %80 = arith.mulf %75, %79 : vector<8x8xf32>
    %cst_55 = arith.constant dense<0.000000e+00> : vector<8x8xf32>
    %81 = tpu.matmul %80, %66, %cst_55 {dimension_numbers = #tpu.dot_dimension_numbers<[1], [0], [0], [1], [0, 0, 1, 1], [], []>} : vector<8x8xf32>, vector<8x8xf32>, vector<8x8xf32> -> vector<8x8xf32>
    %c0_56 = arith.constant 0 : index
    %c24_57 = arith.constant 24 : index
    %82 = vector.load %arg15[%c0_56, %c24_57] : memref<8x32xf32, #tpu.memory_space<vmem>>, vector<8x8xf32>
    tpu.vector_store %arg15[%c0_56, %c24_57], %81 {strides = array<i32>} : memref<8x32xf32, #tpu.memory_space<vmem>>, vector<8x8xf32>,
    %c0_58 = arith.constant 0 : index
    %c0_59 = arith.constant 0 : index
    %83 = vector.load %arg15[%c0_58, %c0_59] : memref<8x32xf32, #tpu.memory_space<vmem>>, vector<8x32xf32>
    %c0_60 = arith.constant 0 : index
    %c0_61 = arith.constant 0 : index
    %84 = vector.load %arg9[%c0_60, %c0_61] : memref<32x32xf32, #tpu.memory_space<vmem>>, vector<32x32xf32>
    %cst_62 = arith.constant dense<0.000000e+00> : vector<8x32xf32>
    %85 = tpu.matmul %83, %84, %cst_62 {dimension_numbers = #tpu.dot_dimension_numbers<[1], [0], [0], [1], [0, 0, 1, 1], [], []>} : vector<8x32xf32>, vector<32x32xf32>, vector<8x32xf32> -> vector<8x32xf32>
    %c0_63 = arith.constant 0 : index
    %c0_64 = arith.constant 0 : index
    %c0_65 = arith.constant 0 : index
    %86 = vector.load %arg2[%c0_63, %c0_64, %c0_65] : memref<1x8x32xf32, #tpu.memory_space<vmem>>, vector<1x8x32xf32>
    %87 = vector.shape_cast %86 : vector<1x8x32xf32> to vector<8x32xf32>
    %88 = arith.addf %87, %85 : vector<8x32xf32>
    %cst_66 = arith.constant dense<0.000000e+00> : vector<8xf32>
    %89 = vector.multi_reduction <add>, %88, %cst_66 [1] : vector<8x32xf32> to vector<8xf32>
    %90 = vector.shape_cast %89 : vector<8xf32> to vector<8x1xf32>
    %cst_67 = arith.constant 3.200000e+01 : f32
    %91 = vector.broadcast %cst_67 : f32 to vector<8x1xf32>
    %92 = arith.divf %90, %91 : vector<8x1xf32>
    %93 = vector.broadcast %92 : vector<8x1xf32> to vector<8x32xf32>
    %94 = arith.subf %88, %93 : vector<8x32xf32>
    %95 = vector.broadcast %92 : vector<8x1xf32> to vector<8x32xf32>
    %96 = arith.subf %88, %95 : vector<8x32xf32>
    %97 = arith.mulf %94, %96 : vector<8x32xf32>
    %cst_68 = arith.constant dense<0.000000e+00> : vector<8xf32>
    %98 = vector.multi_reduction <add>, %97, %cst_68 [1] : vector<8x32xf32> to vector<8xf32>
    %99 = vector.shape_cast %98 : vector<8xf32> to vector<8x1xf32>
    %cst_69 = arith.constant 3.200000e+01 : f32
    %100 = vector.broadcast %cst_69 : f32 to vector<8x1xf32>
    %101 = arith.divf %99, %100 : vector<8x1xf32>
    %102 = vector.broadcast %92 : vector<8x1xf32> to vector<8x32xf32>
    %103 = arith.subf %88, %102 : vector<8x32xf32>
    %cst_70 = arith.constant 9.99999997E-7 : f32
    %104 = vector.broadcast %cst_70 : f32 to vector<8x1xf32>
    %105 = arith.addf %101, %104 : vector<8x1xf32>
    %106 = math.rsqrt %105 : vector<8x1xf32>
    %107 = vector.broadcast %106 : vector<8x1xf32> to vector<8x32xf32>
    %108 = arith.mulf %103, %107 : vector<8x32xf32>
    %c0_71 = arith.constant 0 : index
    %c0_72 = arith.constant 0 : index
    %109 = vector.load %arg10[%c0_71, %c0_72] : memref<1x32xf32, #tpu.memory_space<vmem>>, vector<1x32xf32>
    %110 = vector.broadcast %109 : vector<1x32xf32> to vector<8x32xf32>
    %111 = arith.mulf %108, %110 : vector<8x32xf32>
    %c0_73 = arith.constant 0 : index
    %c0_74 = arith.constant 0 : index
    %112 = vector.load %arg11[%c0_73, %c0_74] : memref<1x32xf32, #tpu.memory_space<vmem>>, vector<1x32xf32>
    %113 = vector.broadcast %112 : vector<1x32xf32> to vector<8x32xf32>
    %114 = arith.addf %111, %113 : vector<8x32xf32>
    %c0_75 = arith.constant 0 : index
    %c0_76 = arith.constant 0 : index
    %c0_77 = arith.constant 0 : index
    %115 = vector.load %arg12[%c0_75, %c0_76, %c0_77] : memref<1x8x32xf32, #tpu.memory_space<vmem>>, vector<1x8x32xf32>
    %116 = vector.shape_cast %115 : vector<1x8x32xf32> to vector<8x32xf32>
    %117 = vector.shape_cast %114 : vector<8x32xf32> to vector<1x8x32xf32>
    tpu.vector_store %arg12[%c0_75, %c0_76, %c0_77], %117 {strides = array<i32>} : memref<1x8x32xf32, #tpu.memory_space<vmem>>, vector<1x8x32xf32>,
    return
  }
  func.func @transform_0(%arg0: i32, %arg1: i32) -> (i32, i32, i32) {
    %c0_i32 = arith.constant 0 : i32
    %c0_i32_0 = arith.constant 0 : i32
    return %arg0, %arg1, %c0_i32 : i32, i32, i32
  }
  func.func @transform_1(%arg0: i32, %arg1: i32) -> (i32, i32, i32) {
    %c0_i32 = arith.constant 0 : i32
    %c0_i32_0 = arith.constant 0 : i32
    %c0_i32_1 = arith.constant 0 : i32
    return %arg0, %c0_i32, %c0_i32_0 : i32, i32, i32
  }
  func.func @transform_2(%arg0: i32, %arg1: i32) -> (i32, i32, i32) {
    %c0_i32 = arith.constant 0 : i32
    %c0_i32_0 = arith.constant 0 : i32
    %c0_i32_1 = arith.constant 0 : i32
    return %arg0, %c0_i32, %c0_i32_0 : i32, i32, i32
  }
  func.func @transform_3(%arg0: i32, %arg1: i32) -> (i32, i32, i32, i32) {
    %c0_i32 = arith.constant 0 : i32
    %c0_i32_0 = arith.constant 0 : i32
    %c0_i32_1 = arith.constant 0 : i32
    %c0_i32_2 = arith.constant 0 : i32
    return %c0_i32, %c0_i32_0, %arg1, %c0_i32_1 : i32, i32, i32, i32
  }
  func.func @transform_4(%arg0: i32, %arg1: i32) -> (i32, i32) {
    %c0_i32 = arith.constant 0 : i32
    %c0_i32_0 = arith.constant 0 : i32
    %c0_i32_1 = arith.constant 0 : i32
    return %c0_i32, %c0_i32_0 : i32, i32
  }
  func.func @transform_5(%arg0: i32, %arg1: i32) -> (i32, i32) {
    %c0_i32 = arith.constant 0 : i32
    %c0_i32_0 = arith.constant 0 : i32
    %c0_i32_1 = arith.constant 0 : i32
    return %c0_i32, %c0_i32_0 : i32, i32
  }
  func.func @transform_6(%arg0: i32, %arg1: i32) -> (i32, i32) {
    %c0_i32 = arith.constant 0 : i32
    %c0_i32_0 = arith.constant 0 : i32
    %c0_i32_1 = arith.constant 0 : i32
    return %c0_i32, %c0_i32_0 : i32, i32
  }
  func.func @transform_7(%arg0: i32, %arg1: i32) -> (i32, i32) {
    %c0_i32 = arith.constant 0 : i32
    %c0_i32_0 = arith.constant 0 : i32
    %c0_i32_1 = arith.constant 0 : i32
    return %c0_i32, %c0_i32_0 : i32, i32
  }
  func.func @transform_8(%arg0: i32, %arg1: i32) -> (i32, i32) {
    %c0_i32 = arith.constant 0 : i32
    %c0_i32_0 = arith.constant 0 : i32
    %c0_i32_1 = arith.constant 0 : i32
    return %c0_i32, %c0_i32_0 : i32, i32
  }
  func.func @transform_9(%arg0: i32, %arg1: i32) -> (i32, i32) {
    %c0_i32 = arith.constant 0 : i32
    %c0_i32_0 = arith.constant 0 : i32
    %c0_i32_1 = arith.constant 0 : i32
    return %c0_i32, %c0_i32_0 : i32, i32
  }
  func.func @transform_10(%arg0: i32, %arg1: i32) -> (i32, i32, i32) {
    %c0_i32 = arith.constant 0 : i32
    %c0_i32_0 = arith.constant 0 : i32
    return %arg0, %arg1, %c0_i32 : i32, i32, i32
  }
}

</mosaic_0001>

<bundles_post_ra>
// kernel: tpu_custom_call.1
= control target key start
LH: loop header
LB: loop body
LE: loop exit
PB: predicated region body
PF: predicated region fallthrough
CT: control target
= control target key end

     0   :  { %s2168_s0 = inlined_call_operand.hbm [shape: f32[2,8,32], index: 0, kind: input, shape index: {}]   ;;  %s2169_s1 = inlined_call_operand.hbm [shape: f32[2,8,32], index: 1, kind: input, shape index: {}]   ;;  %s2170_s2 = inlined_call_operand.hbm [shape: f32[2,8,32], index: 2, kind: input, shape index: {}]   ;;  %s2171_s3 = inlined_call_operand.hbm [shape: f32[1,1,8,8], index: 3, kind: input, shape index: {}]   ;;  %s2172_s4 = inlined_call_operand.hbm [shape: f32[32,32], index: 4, kind: input, shape index: {}]   ;;  %s2173_s5 = inlined_call_operand.hbm [shape: f32[32,32], index: 5, kind: input, shape index: {}]   ;;  %s2174_s6 = inlined_call_operand.hbm [shape: f32[32,32], index: 6, kind: input, shape index: {}]   ;;  %s2175_s7 = inlined_call_operand.hbm [shape: f32[32,32], index: 7, kind: input, shape index: {}]   ;;  %s2176_s8 = inlined_call_operand.vmem [shape: f32[1,32], index: 8, kind: input, shape index: {}]   ;;  %s2177_s9 = inlined_call_operand.vmem [shape: f32[1,32], index: 9, kind: input, shape index: {}]   ;;  %s2178_s10 = inlined_call_operand.hbm [shape: f32[2,8,32], index: 10, kind: output, shape index: {}]  }
   0x1   :  { %2192 = sst [smem:[#allocation33_spill]] %s2169_s1 }
   0x2   :  { %2193 = sst [smem:[#allocation34_spill]] %s2171_s3 }
   0x3   :  { %2194 = sst [smem:[#allocation35_spill]] %s2172_s4 }
   0x4   :  { %2195 = sst [smem:[#allocation36_spill]] %s2173_s5 }
   0x5   :  { %2196 = sst [smem:[#allocation37_spill]] %s2174_s6 }
   0x6   :  { %2197 = sst [smem:[#allocation38_spill]] %s2175_s7 }
   0x7   :  { %2198 = sst [smem:[#allocation39_spill]] %s2177_s9 }
   0x8   :  { %15 = vsyncpa [#allocation6], 0 }
   0x9   :  { %17 = vsyncpa [#allocation6 + $0x1], 0 }
   0xa   :  { %18 = vsyncpa [#allocation9], 0 }
   0xb   :  { %20 = vsyncpa [#allocation9 + $0x1], 0 }
   0xc   :  { %21 = vsyncpa [#allocation12], 0 }
   0xd   :  { %22 = vsyncpa [#allocation15], 0 }
   0xe   :  { %23 = vsyncpa [#allocation18], 0 }
   0xf   :  { %24 = vsyncpa [#allocation7], 0 }
  0x10   :  { %26 = vsyncpa [#allocation7 + $0x1], 0  ;;  %s1862_s13 = smov 0   ;;  %s1864_s14 = smov 0  }
  0x11   :  { %s1866_s15 = smov 0   ;;  %s1868_s16 = smov 0  }
  0x12   :  { %s1870_s17 = smov 0   ;;  %s1872_s18 = smov 0  }
  0x13 LB: > { %2199 = sst [smem:[#allocation26_spill]] %s1771_s13  ;;  %s1893_s19 = sadd.s32 4294967295, %s1791_s18   ;;  %s1791_s18 = sphi %s1872_s18, %s32_s18   ;;  %s1787_s17 = sphi %s1870_s17, %s2231_s17   ;;  %s1783_s16 = sphi %s1868_s16, %s2230_s16   ;;  %s1779_s15 = sphi %s1866_s15, %s2234_s15   ;;  %s1775_s14 = sphi %s1864_s14, %s2233_s14   ;;  %s1771_s13 = sphi %s1862_s13, %s2232_s13  }
  0x14   : > { %2200 = sst [smem:[#allocation27_spill]] %s1787_s17  ;;  %p1256_p0 = scmp.ge.s32.totalorder %s1791_s18, 1 }
  0x15   : > { %2201 = sst [smem:[#allocation28_spill]] %s1791_s18  ;;  %p67_p1 = scmp.eq.s32.totalorder %s1893_s19, 0 }
  0x16   : > { %p309_p2 = scmp.lt.s32.totalorder %s1791_s18, 3  ;;  %s2202_s3 = sld [smem:[#allocation34_spill]] }
  0x17   : > { %p1262_p4 = scmp.ge.s32.totalorder %s1791_s18, 2  ;;  %s1793_s24 = smov [#allocation11]  }
  0x18   : > { %p1901_p3 = pnand %p1256_p0, %p309_p2  ;;  %s325_s25 = sshll.u32 %s1793_s24, 4  ;;  %s326_s25 = int_to_ptr.vmem [resolvable:$true] %s325_s25 }
  0x19   : > { %s2205_s5 = sld [smem:[#allocation36_spill]]  ;;  %s1794_s30 = smov [#allocation14]  }
  0x1a   : > { %p1327_p5 = pneg %p1901_p3  ;;  %s350_s11 = sshll.u32 %s1794_s30, 4  ;;  %s351_s11 = int_to_ptr.vmem [resolvable:$true] %s350_s11 }
  0x1b   : > { %s2179_s12 = smov 128   ;;  %s2181_s20 = smov 8  }
  0x1c   : > { %s323_s22 = sshll.u32 %s2202_s3, 4  ;;  %p1910_p6 = pnand %p1327_p5, %p67_p1  ;;  %s324_s22 = int_to_ptr.hbm [resolvable:$true] %s323_s22 }
  0x1d   : > { %s1255_s21 = sadd.s32 4294967294, %s1791_s18   ;;  %s44_s24 = sadd.s32 1, %s1787_s17 }
  0x1e   : > { %1330 = dma.hbm_to_vmem [thread:$0]  (!%p1910_p6), %s324_s22, 128, %s326_s25, [#allocation12]  }
  0x1f   : > { %s348_s29 = sshll.u32 %s2205_s5, 4  ;;  %p46_p7 = scmp.ge.s32.totalorder %s44_s24, 2  ;;  %s349_s29 = int_to_ptr.hbm [resolvable:$true] %s348_s29 }
  0x20   : > { %1336 = dma.hbm_to_vmem [thread:$0]  (!%p1910_p6), %s349_s29, 512, %s351_s11, [#allocation15], %s2179_s12, %s2179_s12, %s2181_s20  }
  0x21   : > { %s53_s22 = sadd.s32 1, %s1779_s15  ;;  %p60_p8 = scmp.ne.s32.totalorder %s1779_s15, %s1775_s14 }
  0x22   : > { %p61_p9 = scmp.eq.s32.totalorder %s1791_s18, 0  ;;  %s2236_s24 = smov (%p46_p7, %s44_s24), 0 }
  0x23   : > { %2206 = sst [smem:[#allocation29_spill]] %s2236_s24  ;;  %p66_p11 = scmp.ne.s32.totalorder %s1775_s14, %s1771_s13 }
  0x24   : > { %p1932_p10 = por %p61_p9, %p60_p8  ;;  %s48_s27 = ssub.s32 %s1787_s17, %s2236_s24 }
  0x25   : > { %p296_p12 = scmp.eq.s32.totalorder %s1893_s19, 1  ;;  %p51_p13 = scmp.eq.s32.totalorder %s48_s27, 0 }
  0x26   : > { %p1943_p0 = por %p67_p1, %p66_p11  ;;  %p302_p5 = scmp.eq.s32.totalorder %s1255_s21, 1 }
  0x27   : > { %p1947_p2 = por %p296_p12, %p60_p8  ;;  %p1362_p9 = scmp.lt.s32.totalorder %s1791_s18, 2 }
  0x28   : > { %s1952_s30 = scalar_select %p51_p13, %s1779_s15, %s53_s22  }
  0x29   : > { %s2209_s29 = scalar_select %p1947_p2, 1, 0 }
  0x2a   : > { %2211 = sst [smem:[#allocation31_spill]] %s1952_s30  ;;  %p1954_p7 = por %p302_p5, %p66_p11 }
  0x2b   : > { %2210 = sst [smem:[#allocation30_spill]] %s2209_s29  ;;  %s2186_s12 = sand.u32 1, %s1779_s15  }
  0x2c   : > { %s2212_s11 = scalar_select %p1954_p7, 1, 0 }
  0x2d   : > { %s1961_s20 = sshll.u32 %s1787_s17, 3  ;;  %s1965_s27 = sshll.u32 %s2186_s12, 3 }
  0x2e   : > { %2213 = sst [smem:[#allocation32_spill]] %s2212_s11  ;;  %p1969_p8 = pnand %p1362_p9, %p1932_p10 }
  0x2f   : > { %s418_s21 = sand.u32 1, %s1791_s18   ;;  %s2215_s1 = sld [smem:[#allocation33_spill]] }
  0x30   : > { %s422_s30 = scalar_lea.vmem [#allocation8], %s1965_s27  ;;  %s2216_s4 = sld [smem:[#allocation35_spill]] }
  0x31   : > { %s430_s17 = sshll.u32 %s422_s30, 4  ;;  %s1982_s9 = scalar_lea.sflag [#allocation9], %s418_s21  ;;  %s431_s17 = int_to_ptr.vmem [resolvable:$true] %s430_s17 }
  0x32   : > { %s1797_s5 = smov [#allocation13]   ;;  %s2217_s6 = sld [smem:[#allocation37_spill]] }
  0x33   : > { %s336_s22 = sshll.u32 %s1797_s5, 4  ;;  %s2218_s13 = smov 8   ;;  %s337_s22 = int_to_ptr.vmem [resolvable:$true] %s336_s22 }
  0x34   : > { %s2219_s12 = smov 128   ;;  %s2220_s7 = sld [smem:[#allocation38_spill]] }
  0x35   : > { %s426_s24 = scalar_lea.hbm %s2215_s1, %s1961_s20  ;;  %s1799_s1 = smov [#allocation17]  }
  0x36   : > { %s428_s11 = sshll.u32 %s426_s24, 4  ;;  %s334_s25 = sshll.u32 %s2216_s4, 4  ;;  %s429_s11 = int_to_ptr.hbm [resolvable:$true] %s428_s11  ;;  %s335_s25 = int_to_ptr.hbm [resolvable:$true] %s334_s25 }
  0x37   : > { %1349 = dma.hbm_to_vmem [thread:$0]  (!%p1969_p8), %s429_s11, 128, %s431_s17, %s1982_s9  }
  0x38   : > { %s362_s24 = sshll.u32 %s2217_s6, 4  ;;  %s1798_s11 = smov [#allocation16]   ;;  %s363_s24 = int_to_ptr.hbm [resolvable:$true] %s362_s24 }
  0x39   : > { %1333 = dma.hbm_to_vmem [thread:$0]  (!%p1910_p6), %s335_s25, 512, %s337_s22, [#allocation12], %s2219_s12, %s2219_s12, %s2218_s13  }
  0x3a   : > { %s376_s17 = sshll.u32 %s2220_s7, 4  ;;  %s364_s5 = sshll.u32 %s1798_s11, 4  ;;  %s377_s17 = int_to_ptr.hbm [resolvable:$true] %s376_s17  ;;  %s365_s5 = int_to_ptr.vmem [resolvable:$true] %s364_s5 }
  0x3b   : > { %1339 = dma.hbm_to_vmem [thread:$0]  (!%p1910_p6), %s363_s24, 512, %s365_s5, [#allocation15], %s2219_s12, %s2219_s12, %s2218_s13  }
  0x3c   : > { %s378_s30 = sshll.u32 %s1799_s1, 4  ;;  %s407_s22 = scalar_lea.hbm %s2168_s0, %s1961_s20  ;;  %s379_s30 = int_to_ptr.vmem [resolvable:$true] %s378_s30 }
  0x3d   : > { %1342 = dma.hbm_to_vmem [thread:$0]  (!%p1910_p6), %s377_s17, 512, %s379_s30, [#allocation18], %s2219_s12, %s2219_s12, %s2218_s13  }
  0x3e   : > { %s402_s21 = scalar_lea.vmem [#allocation5], %s1965_s27  ;;  %s409_s6 = sshll.u32 %s407_s22, 4  ;;  %s410_s6 = int_to_ptr.hbm [resolvable:$true] %s409_s6 }
  0x3f   : > { %s411_s11 = sshll.u32 %s402_s21, 4  ;;  %s2221_s24 = sand.u32 1, %s1779_s15   ;;  %s412_s11 = int_to_ptr.vmem [resolvable:$true] %s411_s11 }
  0x40   : > { %s399_s5 = scalar_lea.sflag [#allocation6], %s2221_s24  ;;  %s445_s7 = scalar_lea.hbm %s2170_s2, %s1961_s20 }
  0x41   : > { %1346 = dma.hbm_to_vmem [thread:$0]  (!%p1969_p8), %s410_s6, 128, %s412_s11, %s399_s5  }
  0x42   : > { %s441_s18 = scalar_lea.vmem [#allocation10], %s1965_s27  ;;  %s447_s13 = sshll.u32 %s445_s7, 4  ;;  %s448_s13 = int_to_ptr.hbm [resolvable:$true] %s447_s13 }
  0x43   : > { %s449_s29 = sshll.u32 %s441_s18, 4  ;;  %458 = sbr.rel (%p1901_p3) target bundleno = 1406 (0x57e), region = 60  ;;  %s450_s29 = int_to_ptr.vmem [resolvable:$true] %s449_s29 }
  0x44   : > { %1352 = dma.hbm_to_vmem [thread:$0]  (!%p1969_p8), %s448_s13, 128, %s450_s29, %s1982_s9  }
  0x45   : > { %s2028_s12 = sand.u32 (!%p1901_p3), 1, %s1775_s14  }
  0x46   : > { %s2031_s6 = sshll.u32 (!%p1901_p3), %s2028_s12, 3  ;;  %s461_s20 = scalar_lea.sflag (!%p1901_p3), [#allocation6], %s2028_s12 }
  0x47   : > { %s464_s27 = scalar_lea.vmem (!%p1901_p3), [#allocation5], %s2031_s6 }
  0x48   : > { %1746 = dma.done.wait (%p1943_p0), %s461_s20, 128  }
  0x49   : > { %1748 = vsyncadd (%p1943_p0), %s461_s20, 4294967168  ;;  %s470_s3 = sand.u32 1, %s1893_s19   ;;  %s474_s9 = scalar_lea.vmem [#allocation8], %s2031_s6 }
  0x4a   : > { %s471_s7 = scalar_lea.sflag [#allocation9], %s470_s3 }
  0x4b   : > { %1750 = dma.done.wait (%p1943_p0), %s471_s7, 256  }
  0x4c   : > { %1752 = vsyncadd (%p1943_p0), %s471_s7, 4294967040  ;;  %s484_s18 = scalar_lea.vmem [#allocation10], %s2031_s6 }
  0x4d   : > { %1754 = dma.done.wait (%p67_p1), [#allocation12], 640  }
  0x4e   : > { %1756 = vsyncadd (%p67_p1), [#allocation12], 4294966656 }
  0x4f   : > { %1758 = dma.done.wait (%p67_p1), [#allocation15], 1024  }
  0x50   : > { %1760 = vsyncadd (%p67_p1), [#allocation15], 4294966272 }
  0x51   : > { %1762 = dma.done.wait (%p67_p1), [#allocation18], 512  }
  0x52   : > { %1764 = vsyncadd (%p67_p1), [#allocation18], 4294966784  ;;  %v565_v0 = vld [vmem:[#allocation14 + $0x18] sm:$0xff]  ;;  %v564_v1 = vld [vmem:[#allocation14 + $0x10] sm:$0xff]  ;;  %vm566_vm0 = vcmask 261120   ;;  %vm652_vm1 = vcmask 64512  }
  0x53   : > { %582 = vmatpush.msra.mxu0 %v565_v0  ;;  %v624_v2 = vld [vmem:[#allocation13 + $0x18] sm:$0xff]  ;;  %v563_v3 = vld [vmem:[#allocation14 + $0x8] sm:$0xff]  ;;  %v623_v4 = vld [vmem:[#allocation13 + $0x10] sm:$0xff]  ;;  %s1800_s19 = smov 104   ;;  %s1801_s23 = smov 112  }
  0x54   : > { %641 = vmatpush.msra.mxu2 %v624_v2  ;;  %v622_v5 = vld [vmem:[#allocation13 + $0x8] sm:$0xff]  ;;  %v562_v6 = vld [vmem:[#allocation14] sm:$0xff]  ;;  %s1802_s28 = smov 120   ;;  %v651_v19 = vld [vmem:[#allocation11] sm:$0xff]  ;;  %s1803_s29 = smov 8  }
  0x55   : > { %583 = vmatpush.msra.mxu0 %v564_v1  ;;  %v561_v7 = vld [vmem:[%s474_s9] sm:$0xff]  ;;  %v2060_v9 = vld [vmem:[%s464_s27] sm:$0xff]  ;;  %s1804_s17 = smov 16   ;;  %s1805_s30 = smov 24  }
  0x56   : > { %642 = vmatpush.msra.mxu2 %v623_v4  ;;  %v621_v8 = vld [vmem:[#allocation13] sm:$0xff]  ;;  %v595_v23 = vld [vmem:[#allocation16 + $0x18] sm:$0xff]  ;;  %v594_v24 = vld [vmem:[#allocation16 + $0x10] sm:$0xff]  ;;  %s1296_s4 = sshll.u32 %s1783_s16, 3  ;;  %s2225_s13 = sld [smem:[#allocation39_spill]] }
  0x57   : > { %584 = vmatpush.msra.mxu0 %v563_v3  ;;  %611 = vmatpush.msra.mxu1 %v595_v23  ;;  %v593_v25 = vld [vmem:[#allocation16 + $0x8] sm:$0xff]  ;;  %v592_v26 = vld [vmem:[#allocation16] sm:$0xff]  ;;  %s1076_s24 = scalar_lea.hbm %s2178_s10, %s1296_s4  ;;  %s556_s16 = scalar_lea.vmem [#allocation19], %s2031_s6 }
  0x58   : > { %643 = vmatpush.msra.mxu2 %v622_v5  ;;  %v591_v27 = vld [vmem:[%s484_s18] sm:$0xff]  ;;  %s1078_s20 = sshll.u32 %s556_s16, 4  ;;  %s1080_s27 = sshll.u32 %s1076_s24, 4  ;;  %s1079_s20 = int_to_ptr.vmem [resolvable:$true] %s1078_s20  ;;  %s1081_s27 = int_to_ptr.hbm [resolvable:$true] %s1080_s27 }
  0x59   : > { %585 = vmatpush.msra.mxu0 %v562_v6  ;;  %612 = vmatpush.msra.mxu1 %v594_v24  ;;  %s1065_s3 = scalar_lea.sflag [#allocation7], %s2028_s12  ;;  %s1707_s7 = sshra.s32 %s1081_s27, 4  ;;  %s1708_s7 = int_to_ptr.hbm [resolvable:$true] %s1707_s7 }
  0x5a   : > { %1279 = vmatmul.msk.f32.vlgmr.msra.gmra.mxu0 %vm566_vm0, %v561_v7  ;;  %644 = vmatpush.msra.mxu2 %v621_v8  ;;  %s1709_s9 = scalar_lea.hbm %s1708_s7, 8  ;;  %s1713_s6 = scalar_lea.hbm %s2178_s10, 16 }
  0x5b   : > { %1281 = vmatmul.msk.f32.vlgmr.msra.gmra.mxu2 %vm566_vm0, %v2060_v9  ;;  %613 = vmatpush.msra.mxu1 %v593_v25  ;;  %p1710_p1 = scmp.ne.s32.totalorder %s1708_s7, %s1709_s9  ;;  %p1714_p10 = scmp.lt.s32.totalorder %s1708_s7, %s2178_s10 }
  0x5c   : > { %v1432_v23 = vld [vmem:[%s2225_s13] ss:$0 sm:$0xff]  ;;  %p1715_p11 = scmp.lt.s32.totalorder %s1713_s6, %s1709_s9 }
  0x5d   : > { %614 = vmatpush.msra.mxu1 %v592_v26  ;;  %p1711_p3 = pnand %p1710_p1, %p1947_p2 }
  0x5e   : > { %1280 = vmatmul.msk.f32.vlgmr.msra.gmra.mxu1 %vm566_vm0, %v591_v27  ;;  %p1716_p12 = por %p1715_p11, %p1714_p10 }
  0x5f   : > { %p1712_p6 = pneg %p1711_p3 }
  0x61   : > { %p1717_p13 = pnand %p1716_p12, %p1712_p6 }
  0xd7   : > { %v587_v10 = vpop.f32.mrf.mxu0 }
  0xd8   : > { %590 = vst.msk [vmem:[#allocation2] sm:$0xff] %vm566_vm0, %v587_v10 }
  0xdb   : > { %v616_v42 = vpop.f32.mrf.mxu1 }
  0xdc   : > { %619 = vst.msk [vmem:[#allocation3] sm:$0xff] %vm566_vm0, %v616_v42 }
  0xde   : > { %v646_v12 = vpop.f32.mrf.mxu2 }
  0xdf   : > { %v905_v11 = vld [vmem:[#allocation2] sm:$0xff] }
  0xe0   : > { %911 = vrot.lane.b32.xlu2 %v905_v11, %s1800_s19  ;;  %822 = vrot.lane.b32.xlu0 %v905_v11, %s1801_s23 }
  0xe1   : > { %733 = vrot.lane.b32.xlu1 %v905_v11, %s1802_s28  ;;  %1282 = vmatpush.xpose.msk.msra.mxu3 %vm652_vm1, %v905_v11 }
  0xe3   : > { %v650_v44 = vld [vmem:[#allocation3] sm:$0xff] }
  0xe4   : > { %1283 = vmatmul.msk.f32.vlgmr.msra.gmra.mxu3 %vm652_vm1, %v646_v12 }
  0xe5   : > { %721 = vmatpush.msrb.mxu3 %v650_v44 }
  0xe8   : > { %908 = vrot.lane.b32.xlu2 %v646_v12, %s1800_s19  ;;  %819 = vrot.lane.b32.xlu0 %v646_v12, %s1801_s23 }
  0xe9   : > { %730 = vrot.lane.b32.xlu1 %v646_v12, %s1802_s28 }
 0x13a   : > { %v912_v15 = vpop.permute.xlu2 %911 }
 0x142   : > { %v909_v18 = vpop.permute.xlu2 %908 }
 0x152   : > { %v823_v13 = vpop.permute.xlu0 %822 }
 0x153   : > { %v734_v14 = vpop.permute.xlu1 %733  ;;  %1288 = vmatpush.xpose.msk.msrb.mxu2 %vm652_vm1, %v823_v13 }
 0x154   : > { %1285 = vmatpush.xpose.msk.msrb.mxu0 %vm652_vm1, %v734_v14 }
 0x158   : > { %1291 = vmatpush.xpose.msk.msra.mxu0 %vm652_vm1, %v912_v15 }
 0x15a   : > { %v820_v16 = vpop.permute.xlu0 %819 }
 0x15b   : > { %v731_v17 = vpop.permute.xlu1 %730  ;;  %1289 = vmatmul.msk.f32.vlgmr.msrb.gmra.mxu2 %vm652_vm1, %v820_v16 }
 0x15c   : > { %1286 = vmatmul.msk.f32.vlgmr.msrb.gmra.mxu0 %vm652_vm1, %v731_v17 }
 0x164   : > { %1292 = vmatmul.msk.f32.vlgmr.msra.gmra.mxu0 %vm652_vm1, %v909_v18 }
 0x167   : > { %v676_v20 = vpop.f32.mrf.mxu3 }
 0x168   : > { %v677_v21 = vadd.f32 %v676_v20, %v651_v19 }
 0x16a   : > { %v679_v22 = vsel %vm652_vm1, %v677_v21, -inf }
 0x16b   : > { %680 = vmax.xlane.f32.xlu0 %v679_v22 }
 0x1d9   : > { %v756_v28 = vpop.f32.mrf.mxu0 }
 0x1da   : > { %v757_v29 = vadd.f32 %v756_v28, %v651_v19 }
 0x1dc   : > { %v759_v30 = vsel %vm652_vm1, %v757_v29, -inf }
 0x1dd   : > { %760 = vmax.xlane.f32.xlu1 %v759_v30 }
 0x1de   : > { %v681_v31 = vpop.xlane.xlu0 %680  ;;  %v845_v32 = vpop.f32.mrf.mxu2 }
 0x1df   : > { %v682_v33 = vsub.f32 %v677_v21, %v681_v31  ;;  %v846_v34 = vadd.f32 %v845_v32, %v651_v19 }
 0x1e1   : > { %v683_v35 = vmul.f32 1.442695, %v682_v33  ;;  %v848_v36 = vsel %vm652_vm1, %v846_v34, -inf  ;;  %v934_v37 = vpop.f32.mrf.mxu0 }
 0x1e2   : > { %849 = vmax.xlane.f32.xlu2 %v848_v36  ;;  %v935_v38 = vadd.f32 %v934_v37, %v651_v19 }
 0x1e3   : > { %1433 = vpow2.f32 %v683_v35 }
 0x1e4   : > { %v937_v40 = vsel %vm652_vm1, %v935_v38, -inf }
 0x1e9   : > { %v1434_v39 = vpop.eup %1433 }
 0x1ea   : > { %938 = vmax.xlane.f32.xlu2 %v937_v40  ;;  %v685_v41 = vsel %vm652_vm1, %v1434_v39, 0.0 }
 0x1eb   : > { %686 = vadd.xlane.f32.xlu0 %v685_v41 }
 0x250   : > { %v761_v43 = vpop.xlane.xlu1 %760 }
 0x251   : > { %v762_v45 = vsub.f32 %v757_v29, %v761_v43 }
 0x253   : > { %v763_v46 = vmul.f32 1.442695, %v762_v45 }
 0x255   : > { %1435 = vpow2.f32 %v763_v46  ;;  %v850_v47 = vpop.xlane.xlu2 %849 }
 0x256   : > { %v851_v48 = vsub.f32 %v846_v34, %v850_v47 }
 0x258   : > { %v852_v49 = vmul.f32 1.442695, %v851_v48 }
 0x25a   : > { %1437 = vpow2.f32 %v852_v49 }
 0x25b   : > { %v2089_v50 = vpop.eup %1435 }
 0x25c   : > { %v765_v51 = vsel %vm652_vm1, %v2089_v50, 0.0 }
 0x25d   : > { %766 = vadd.xlane.f32.xlu1 %v765_v51  ;;  %v939_v52 = vpop.xlane.xlu2 %938 }
 0x25e   : > { %v940_v53 = vsub.f32 %v935_v38, %v939_v52  ;;  %v687_v54 = vpop.xlane.xlu0 %686  ;;  %v998_v52 = vld [vmem:[#allocation17 + $0x18] sm:$0xff] }
 0x25f   : > { %1439 = vrcp.f32 %v687_v54  ;;  %v699_v62 = vand.u32 2147483648, %v687_v54  ;;  %v697_v1 = vand.u32 2147483647, %v687_v54  ;;  %vm693_vm3 = vweird.f32 %v687_v54  ;;  %1014 = vmatpush.msra.mxu2 %v998_v52 }
 0x260   : > { %v2093_v55 = vpop.eup %1437  ;;  %v941_v56 = vmul.f32 1.442695, %v940_v53  ;;  %v997_v53 = vld [vmem:[#allocation17 + $0x10] sm:$0xff] }
 0x261   : > { %v854_v57 = vsel %vm652_vm1, %v2093_v55, 0.0  ;;  %v700_v3 = vor.u32 1.1754944e-38, %v699_v62  ;;  %vm698_vm5 = vcmp.eq.f32.partialorder %v697_v1, 8.507059e+37  ;;  %1015 = vmatpush.msra.mxu2 %v997_v53 }
 0x262   : > { %1441 = vpow2.f32 %v941_v56  ;;  %855 = vadd.xlane.f32.xlu2 %v854_v57 }
 0x265   : > { %v1440_v58 = vpop.eup %1439 }
 0x266   : > { %v689_v59 = vmul.f32 %v1440_v58, %v687_v54  ;;  %vm694_vm2 = vweird.f32 %v1440_v58  ;;  %v996_v54 = vld [vmem:[#allocation17 + $0x8] sm:$0xff] }
 0x267   : > { %vm695_vm4 = vmor %vm693_vm3, %vm694_vm2  ;;  %1016 = vmatpush.msra.mxu2 %v996_v54 }
 0x268   : > { %v2097_v60 = vpop.eup %1441  ;;  %v690_v61 = vsub.f32 1.0, %v689_v59 }
 0x269   : > { %v943_v63 = vsel %vm652_vm1, %v2097_v60, 0.0 }
 0x26a   : > { %v691_v0 = vmul.f32 %v1440_v58, %v690_v61  ;;  %944 = vadd.xlane.f32.xlu0 %v943_v63  ;;  %v1806_v63 = vmov 32.0  }
 0x26c   : > { %v692_v2 = vadd.f32 %v1440_v58, %v691_v0 }
 0x26e   : > { %v696_v4 = vsel %vm695_vm4, %v1440_v58, %v692_v2  ;;  %vm814_vm4 = vcmask 130112  }
 0x26f   : > { %v701_v5 = vsel %vm698_vm5, %v700_v3, %v696_v4  ;;  %vm992_vm5 = vcmask 261312  }
 0x270   : > { %v702_v6 = vmul.f32 %v1434_v39, %v701_v5 }
 0x272   : > { %1284 = vmatmul.msk.f32.vlgmr.msrb.gmra.mxu3 %vm652_vm1, %v702_v6 }
 0x276   : > { %784 = vrot.lane.b32.xlu1 %v650_v44, %s1802_s28 }
 0x27a   : > { %873 = vrot.lane.b32.xlu2 %v650_v44, %s1801_s23 }
 0x27e   : > { %962 = vrot.lane.b32.xlu0 %v650_v44, %s1800_s19 }
 0x2d0   : > { %v767_v7 = vpop.xlane.xlu1 %766 }
 0x2d1   : > { %1443 = vrcp.f32 %v767_v7  ;;  %v779_v19 = vand.u32 2147483648, %v767_v7  ;;  %vm773_vm7 = vweird.f32 %v767_v7  ;;  %v777_v21 = vand.u32 2147483647, %v767_v7 }
 0x2d3   : > { %v780_v27 = vor.u32 1.1754944e-38, %v779_v19  ;;  %vm778_vm11 = vcmp.eq.f32.partialorder %v777_v21, 8.507059e+37 }
 0x2d5   : > { %v856_v8 = vpop.xlane.xlu2 %855 }
 0x2d6   : > { %1445 = vrcp.f32 %v856_v8  ;;  %v868_v22 = vand.u32 2147483648, %v856_v8  ;;  %v866_v25 = vand.u32 2147483647, %v856_v8  ;;  %vm862_vm10 = vweird.f32 %v856_v8 }
 0x2d7   : > { %v1444_v10 = vpop.eup %1443 }
 0x2d8   : > { %v769_v11 = vmul.f32 %v1444_v10, %v767_v7  ;;  %vm774_vm6 = vweird.f32 %v1444_v10  ;;  %v869_v30 = vor.u32 1.1754944e-38, %v868_v22  ;;  %vm867_vm13 = vcmp.eq.f32.partialorder %v866_v25, 8.507059e+37 }
 0x2d9   : > { %vm2105_vm8 = vmor %vm773_vm7, %vm774_vm6 }
 0x2da   : > { %v770_v12 = vsub.f32 1.0, %v769_v11 }
 0x2dc   : > { %v1446_v13 = vpop.eup %1445  ;;  %v771_v14 = vmul.f32 %v1444_v10, %v770_v12 }
 0x2dd   : > { %v858_v15 = vmul.f32 %v1446_v13, %v856_v8  ;;  %v874_v16 = vpop.permute.xlu2 %873  ;;  %v945_v17 = vpop.xlane.xlu0 %944  ;;  %vm863_vm9 = vweird.f32 %v1446_v13 }
 0x2de   : > { %v772_v18 = vadd.f32 %v1444_v10, %v771_v14  ;;  %1447 = vrcp.f32 %v945_v17  ;;  %894 = vmatpush.msra.mxu3 %v874_v16  ;;  %vm864_vm12 = vmor %vm862_vm10, %vm863_vm9  ;;  %v957_v37 = vand.u32 2147483648, %v945_v17  ;;  %v955_v41 = vand.u32 2147483647, %v945_v17 }
 0x2df   : > { %v859_v20 = vsub.f32 1.0, %v858_v15  ;;  %vm951_vm15 = vweird.f32 %v945_v17  ;;  %1449 = vrcp.f32 %v1806_v63 }
 0x2e0   : > { %v776_v26 = vsel %vm2105_vm8, %v1444_v10, %v772_v18  ;;  %v958_v43 = vor.u32 1.1754944e-38, %v957_v37  ;;  %vm956_vm3 = vcmp.eq.f32.partialorder %v955_v41, 8.507059e+37 }
 0x2e1   : > { %v860_v24 = vmul.f32 %v1446_v13, %v859_v20  ;;  %v781_v33 = vsel %vm778_vm11, %v780_v27, %v776_v26  ;;  %v1431_v20 = vld [vmem:[%s2176_s8] ss:$0 sm:$0xff] }
 0x2e2   : > { %v782_v39 = vmul.f32 %v2089_v50, %v781_v33 }
 0x2e3   : > { %v861_v28 = vadd.f32 %v1446_v13, %v860_v24 }
 0x2e4   : > { %v1448_v29 = vpop.eup %1447 }
 0x2e5   : > { %v865_v31 = vsel %vm864_vm12, %v1446_v13, %v861_v28  ;;  %v947_v32 = vmul.f32 %v1448_v29, %v945_v17  ;;  %vm952_vm14 = vweird.f32 %v1448_v29  ;;  %v1450_v0 = vpop.eup %1449 }
 0x2e6   : > { %v870_v34 = vsel %vm867_vm13, %v869_v30, %v865_v31  ;;  %vm953_vm2 = vmor %vm951_vm15, %vm952_vm14  ;;  %v1028_v1 = vmul.f32 32.0, %v1450_v0  ;;  %vm1032_vm6 = vweird.f32 %v1450_v0 }
 0x2e7   : > { %v948_v35 = vsub.f32 1.0, %v947_v32  ;;  %v871_v36 = vmul.f32 %v2093_v55, %v870_v34  ;;  %v995_v55 = vld [vmem:[#allocation17] sm:$0xff] }
 0x2e8   : > { %v785_v38 = vpop.permute.xlu1 %784  ;;  %1017 = vmatpush.msra.mxu2 %v995_v55  ;;  %v1029_v2 = vsub.f32 1.0, %v1028_v1 }
 0x2e9   : > { %v949_v40 = vmul.f32 %v1448_v29, %v948_v35  ;;  %805 = vmatpush.msrb.mxu1 %v785_v38  ;;  %1290 = vmatmul.msk.f32.vlgmr.msra.gmra.mxu3 %vm652_vm1, %v871_v36 }
 0x2ea   : > { %1287 = vmatmul.msk.f32.vlgmr.msrb.gmra.mxu1 %vm652_vm1, %v782_v39  ;;  %v1030_v3 = vmul.f32 %v1450_v0, %v1029_v2 }
 0x2eb   : > { %v950_v42 = vadd.f32 %v1448_v29, %v949_v40 }
 0x2ec   : > { %v1031_v4 = vadd.f32 %v1450_v0, %v1030_v3 }
 0x2ed   : > { %v954_v44 = vsel %vm953_vm2, %v1448_v29, %v950_v42 }
 0x2ee   : > { %v959_v45 = vsel %vm956_vm3, %v958_v43, %v954_v44  ;;  %v1033_v5 = vsel %vm1032_vm6, %v1450_v0, %v1031_v4 }
 0x2ef   : > { %v960_v46 = vmul.f32 %v2097_v60, %v959_v45 }
 0x2f0   : > { %v963_v47 = vpop.permute.xlu0 %962 }
 0x2f1   : > { %983 = vmatpush.msra.mxu1 %v963_v47 }
 0x2f2   : > { %1293 = vmatmul.msk.f32.vlgmr.msra.gmra.mxu1 %vm652_vm1, %v960_v46 }
 0x2f5   : > { %v723_v48 = vpop.f32.mrf.mxu3 }
 0x2f6   : > { %726 = vst.msk [vmem:[#allocation4] sm:$0xff] %vm652_vm1, %v723_v48  ;;  %vm903_vm1 = vcmask 195712  }
 0x367   : > { %v807_v49 = vpop.f32.mrf.mxu1 }
 0x368   : > { %811 = vrot.lane.b32.xlu1 %v807_v49, %s1803_s29 }
 0x36c   : > { %v896_v50 = vpop.f32.mrf.mxu3 }
 0x36d   : > { %900 = vrot.lane.b32.xlu0 %v896_v50, %s1804_s17 }
 0x36f   : > { %v985_v51 = vpop.f32.mrf.mxu1 }
 0x370   : > { %989 = vrot.lane.b32.xlu2 %v985_v51, %s1805_s30 }
 0x3ca   : > { %v990_v58 = vpop.permute.xlu2 %989 }
 0x3da   : > { %v812_v56 = vpop.permute.xlu1 %811 }
 0x3db   : > { %815 = vst.msk [vmem:[#allocation4] sm:$0xff] %vm814_vm4, %v812_v56 }
 0x3df   : > { %v901_v57 = vpop.permute.xlu0 %900 }
 0x3e0   : > { %904 = vst.msk [vmem:[#allocation4] sm:$0xff] %vm903_vm1, %v901_v57 }
 0x3e1   : > { %993 = vst.msk [vmem:[#allocation4] sm:$0xff] %vm992_vm5, %v990_v58 }
 0x3e8   : > { %v994_v59 = vld [vmem:[#allocation4] sm:$0xff] }
 0x3e9   : > { %1294 = vmatmul.msk.f32.vlgmr.msra.gmra.mxu2 %vm566_vm0, %v994_v59 }
 0x46c   : > { %v1019_v60 = vpop.f32.mrf.mxu2 }
 0x46d   : > { %v1023_v61 = vadd.f32 %v1019_v60, %v2060_v9 }
 0x46f   : > { %v1024_v62 = vsel %vm566_vm0, %v1023_v61, 0.0 }
 0x470   : > { %1025 = vadd.xlane.f32.xlu1 %v1024_v62 }
 0x4e3   : > { %v1026_v6 = vpop.xlane.xlu1 %1025 }
 0x4e4   : > { %v1034_v7 = vmul.f32 %v1033_v5, %v1026_v6 }
 0x4e6   : > { %v1035_v8 = vsub.f32 %v1023_v61, %v1034_v7 }
 0x4e8   : > { %v1036_v10 = vmul.f32 %v1035_v8, %v1035_v8 }
 0x4ea   : > { %v1037_v11 = vsel %vm566_vm0, %v1036_v10, 0.0 }
 0x4eb   : > { %1038 = vadd.xlane.f32.xlu0 %v1037_v11 }
 0x55e   : > { %v1039_v9 = vpop.xlane.xlu0 %1038 }
 0x55f   : > { %v1040_v12 = vmul.f32 %v1039_v9, %v1033_v5 }
 0x561   : > { %v1041_v13 = vadd.f32 1e-06, %v1040_v12 }
 0x563   : > { %1451 = vrsqrt.f32 %v1041_v13  ;;  %vm1048_vm8 = vweird.f32 %v1041_v13 }
 0x569   : > { %v1452_v14 = vpop.eup %1451 }
 0x56a   : > { %v1043_v15 = vmul.f32 %v1452_v14, %v1041_v13  ;;  %vm1049_vm7 = vweird.f32 %v1452_v14 }
 0x56b   : > { %vm1050_vm9 = vmor %vm1048_vm8, %vm1049_vm7 }
 0x56c   : > { %v1044_v16 = vmul.f32 %v1452_v14, %v1043_v15 }
 0x56e   : > { %v1045_v17 = vmul.f32 0.5, %v1044_v16 }
 0x570   : > { %v1046_v18 = vsub.f32 1.5, %v1045_v17 }
 0x572   : > { %v1047_v19 = vmul.f32 %v1452_v14, %v1046_v18 }
 0x574   : > { %v1051_v21 = vsel %vm1050_vm9, %v1452_v14, %v1047_v19 }
 0x575   : > { %v1052_v22 = vmul.f32 %v1051_v21, %v1035_v8 }
 0x577   : > { %v1057_v24 = vmul.f32 %v1431_v20, %v1052_v22 }
 0x579   : > { %v1062_v25 = vadd.f32 %v1432_v23, %v1057_v24 }
 0x57b   : > { %1063 = vst.msk [vmem:[%s556_s16] sm:$0xff] %vm566_vm0, %v1062_v25 }
 0x57c   : > { %1720 = shalt.err (!%p1717_p13)
}
 0x57d   : > { %1325 = dma.vmem_to_hbm [thread:$0]  (%p1947_p2), %s1079_s20, 128, %s1081_s27, %s1065_s3  }
 0x57e PF: > { %s2226_s12 = sld [smem:[#allocation26_spill]]  ;;  %p1354_p0 = pnand %p1262_p4, %p1954_p7 }
 0x57f   : > { %s2228_s17 = sld [smem:[#allocation28_spill]] }
 0x580   : > { %p1355_p5 = pneg %p1354_p0 }
 0x584   : > { %s1092_s30 = sand.u32 1, %s2226_s12  }
 0x585   : > { %s1093_s4 = scalar_lea.sflag [#allocation7], %s1092_s30 }
 0x586   : > { %1766 = dma.done.wait (%p1355_p5), %s1093_s4, 128  }
 0x587   : > { %1768 = vsyncadd (%p1355_p5), %s1093_s4, 4294967168  ;;  %s32_s18 = sadd.s32 1, %s2228_s17   ;;  %s2229_s25 = sld [smem:[#allocation31_spill]] }
 0x588   : > { %p29_p9 = scmp.ge.s32.totalorder %s32_s18, 4   ;;  %s2230_s16 = sld [smem:[#allocation27_spill]] }
 0x589   : > { %s2231_s17 = sld [smem:[#allocation29_spill]]  ;;  %s2232_s13 = smov %s1775_s14 }
 0x58a   : > { %s2233_s14 = smov %s1779_s15  ;;  %31 = sbr.rel (!%p29_p9) target bundleno = 19 (0x13), region = 154 }
 0x58d   : > { %s2234_s15 = smov %s2229_s25 }
 0x58f   :  { %1099 = vsyncpa [#allocation6], 1 }
 0x590   :  { %1101 = vsyncpa [#allocation6 + $0x1], 1 }
 0x591   :  { %1102 = vsyncpa [#allocation9], 1 }
 0x592   :  { %1104 = vsyncpa [#allocation9 + $0x1], 1 }
 0x593   :  { %1105 = vsyncpa [#allocation12], 1 }
 0x594   :  { %1106 = vsyncpa [#allocation15], 1 }
 0x595   :  { %1107 = vsyncpa [#allocation18], 1 }
 0x596   :  { %1108 = vsyncpa [#allocation7], 1 }
 0x597   :  { %1110 = vsyncpa [#allocation7 + $0x1], 1 }

</bundles_post_ra>
